<compile_context>
chip_gen: v7x
topology: tpu7x:2x2x1
jax: 0.10.0
libtpu: 0.0.40
codegen_flags: <defaults>
</compile_context>

<pallas_src>
import functools

import jax
import jax.numpy as jnp
from jax.experimental import pallas as pl
from jax.experimental.pallas import tpu as pltpu

LANES = 128  # TPU lane width; also the MLP hidden size.


def _round_up(n, m):
    return ((n + m - 1) // m) * m


def _cdiv(n, m):
    return (n + m - 1) // m


# ----------------------------------------------------------------------------
# Kernel: fused 4-layer MLP + exact 2-class softmax (sigmoid of logit diff)
# ----------------------------------------------------------------------------
def mlp_softmax_kernel(x_ref, w1_ref, b1_ref, w2_ref, b2_ref,
                       w3_ref, b3_ref, wd_ref, bd_ref, o_ref):
    bf16 = jnp.bfloat16

    # bf16 operands feed the MXU natively; accumulate in f32; keep the
    # element-wise path (bias add / ReLU / sigmoid) in f32.
    x = x_ref[...].astype(bf16)                                        # (TB, F)

    h = jnp.dot(x, w1_ref[...], preferred_element_type=jnp.float32) + b1_ref[...]
    h = jnp.maximum(h, 0.0)

    h = jnp.dot(h.astype(bf16), w2_ref[...],
                preferred_element_type=jnp.float32) + b2_ref[...]
    h = jnp.maximum(h, 0.0)

    h = jnp.dot(h.astype(bf16), w3_ref[...],
                preferred_element_type=jnp.float32) + b3_ref[...]
    h = jnp.maximum(h, 0.0)

    # softmax over 2 classes == [1 - sigmoid(d), sigmoid(d)] with d = l1 - l0.
    # wd_ref holds (w5[:,1]-w5[:,0]) replicated across all 128 lanes, so this is
    # a lane-dense MXU pass and d is identical in every lane (no XLU reduction).
    d = jnp.dot(h.astype(bf16), wd_ref[...],
                preferred_element_type=jnp.float32) + bd_ref[...]      # (TB, 128)

    d2 = d[:, :o_ref.shape[1]]                   # (TB, 2); both lanes hold d
    p1 = 0.5 * (1.0 + jnp.tanh(0.5 * d2))        # exact sigmoid via EUP tanh
    lane = jax.lax.broadcasted_iota(jnp.int32, d2.shape, 1)
    # Narrow (TB, 2) store: lane 0 = P(class 0) = 1-p1, lane 1 = P(class 1) = p1.
    o_ref[...] = jnp.where(lane == 0, 1.0 - p1, p1)


# ----------------------------------------------------------------------------
# Wrapper
# ----------------------------------------------------------------------------
@functools.partial(jax.jit, static_argnames=("max_block_b",))
def net_forward(x, params, max_block_b=2048):
    """Fused MLP forward. x: (B, F) float32 -> (B, 2) float32 probabilities."""
    w1, b1, w2, b2, w3, b3, w5, b5 = params
    B, F = x.shape
    H = w1.shape[1]     # 128
    C = w5.shape[1]     # 2

    # ---- one-time wrapper-side weight repacking (tiny; outside the kernel) ----
    bf16 = jnp.bfloat16
    w1_bf = w1.astype(bf16)                                           # (F, H)
    w2_bf = w2.astype(bf16)
    w3_bf = w3.astype(bf16)
    # Fold the 2-class head into a lane-replicated difference weight/bias.
    wd_bf = jnp.broadcast_to((w5[:, 1:2] - w5[:, 0:1]).astype(bf16), (H, LANES))
    bd = jnp.broadcast_to(b5[:, 1:2] - b5[:, 0:1], (1, LANES))        # f32

    # ---- batch tiling ----
    # Multiple of 8 sublanes; >=2 tiles whenever possible (both v7x TensorCores
    # get work); tiles sized ~B/nb to minimize padding; capped at max_block_b
    # rows so double-buffered tiles stay well inside v5e's 16 MiB scoped VMEM.
    B8 = _round_up(max(B, 1), 8)
    nb = max(2, _cdiv(B8, max_block_b))
    nb = min(nb, max(B8 // 8, 1))          # can't have more tiles than 8-row groups
    TB = _round_up(_cdiv(B8, nb), 8)
    nb = _cdiv(B8, TB)
    Bp = nb * TB
    x_p = x if Bp == B else jnp.pad(x, ((0, Bp - B), (0, 0)))

    def resident(shape):
        # Constant index_map: block index never changes -> DMA'd once,
        # stays VMEM-resident across all grid steps.
        return pl.BlockSpec(shape, lambda i: (0,) * len(shape))

    flops = 2 * Bp * (F * H + H * H + H * H + H * LANES)
    bytes_accessed = (4 * x_p.size + 4 * Bp * C
                      + 2 * (w1_bf.size + w2_bf.size + w3_bf.size + wd_bf.size)
                      + 4 * (b1.size + b2.size + b3.size + bd.size))
    cost = pl.CostEstimate(flops=flops, transcendentals=Bp * C,
                           bytes_accessed=bytes_accessed)

    out = pl.pallas_call(
        mlp_softmax_kernel,
        out_shape=jax.ShapeDtypeStruct((Bp, C), jnp.float32),
        grid_spec=pltpu.PrefetchScalarGridSpec(
            num_scalar_prefetch=0,
            grid=(nb,),
            in_specs=[
                pl.BlockSpec((TB, F), lambda i: (i, 0)),        # x tile (pipelined)
                resident((F, H)), resident((1, H)),             # fc1
                resident((H, H)), resident((1, H)),             # fc2
                resident((H, H)), resident((1, H)),             # fc3
                resident((H, LANES)), resident((1, LANES)),     # fc5 (diff head)
            ],
            out_specs=pl.BlockSpec((TB, C), lambda i: (i, 0)),
        ),
        compiler_params=pltpu.CompilerParams(
            dimension_semantics=("parallel",),   # batch axis -> both TCs on v7x
        ),
        cost_estimate=cost,
    )(x_p, w1_bf, b1, w2_bf, b2, w3_bf, b3, wd_bf, bd)

    return out[:B]


# ----------------------------------------------------------------------------
# Deterministic parameter init (PyTorch-style uniform(-1/sqrt(fan_in), +...))
# ----------------------------------------------------------------------------
def init_params(key, feature_size, hidden=128, num_classes=2):
    def linear(key, fan_in, fan_out):
        kw, kb = jax.random.split(key)
        bound = 1.0 / jnp.sqrt(fan_in)
        w = jax.random.uniform(kw, (fan_in, fan_out), jnp.float32, -bound, bound)
        b = jax.random.uniform(kb, (1, fan_out), jnp.float32, -bound, bound)
        return w, b

    k1, k2, k3, k5 = jax.random.split(key, 4)
    w1, b1 = linear(k1, feature_size, hidden)
    w2, b2 = linear(k2, hidden, hidden)
    w3, b3 = linear(k3, hidden, hidden)
    w5, b5 = linear(k5, hidden, num_classes)
    return (w1, b1, w2, b2, w3, b3, w5, b5)


# ----------------------------------------------------------------------------
# Pure-JAX references
# ----------------------------------------------------------------------------
def net_forward_ref(x, params):
    """Plain float32 reference (exactly the PyTorch forward)."""
    w1, b1, w2, b2, w3, b3, w5, b5 = params
    h = jax.nn.relu(x @ w1 + b1)
    h = jax.nn.relu(h @ w2 + b2)
    h = jax.nn.relu(h @ w3 + b3)
    logits = h @ w5 + b5
    return jax.nn.softmax(logits, axis=1)


def net_forward_matched_ref(x, params):
    """Reference that mirrors the kernel's bf16-matmul / diff-head math."""
    w1, b1, w2, b2, w3, b3, w5, b5 = params
    bf16 = jnp.bfloat16
    h = jax.nn.relu(jnp.dot(x.astype(bf16), w1.astype(bf16),
                            preferred_element_type=jnp.float32) + b1)
    h = jax.nn.relu(jnp.dot(h.astype(bf16), w2.astype(bf16),
                            preferred_element_type=jnp.float32) + b2)
    h = jax.nn.relu(jnp.dot(h.astype(bf16), w3.astype(bf16),
                            preferred_element_type=jnp.float32) + b3)
    wd = (w5[:, 1:2] - w5[:, 0:1]).astype(bf16)
    bd = b5[:, 1:2] - b5[:, 0:1]
    d = jnp.dot(h.astype(bf16), wd, preferred_element_type=jnp.float32) + bd
    p1 = 0.5 * (1.0 + jnp.tanh(0.5 * d))
    return jnp.concatenate([1.0 - p1, p1], axis=1)


if __name__ == "__main__":
    # feature_size = border_x * 2 + 1 ; pick border_x = 8 -> 17 features
    BORDER_X = 8
    FEATURE_SIZE = BORDER_X * 2 + 1

    key = jax.random.PRNGKey(0)
    k_params, k_x1, k_x2 = jax.random.split(key, 3)
    params = init_params(k_params, FEATURE_SIZE)

    # Case 1: awkward batch (300) -> 2 tiles of 152 rows (only 4 padded rows).
    x_big = jax.random.normal(k_x1, (300, FEATURE_SIZE), dtype=jnp.float32)
    out_big = jax.block_until_ready(net_forward(x_big, params))
    assert out_big.shape == (300, 2)
    # Tight check vs a reference that mirrors the kernel's bf16/diff-head math.
    assert jnp.allclose(out_big, net_forward_matched_ref(x_big, params),
                        atol=2e-3), "mismatch vs bf16-matched reference (big)"
    # Loose check vs the plain f32 reference (bf16 matmul quantization only).
    assert jnp.allclose(out_big, net_forward_ref(x_big, params),
                        atol=2e-2), "mismatch vs f32 reference (big)"
    assert jnp.allclose(jnp.sum(out_big, axis=1), 1.0, atol=1e-5)

    # Case 2: tiny batch (single 8-row tile path).
    x_small = jax.random.normal(k_x2, (8, FEATURE_SIZE), dtype=jnp.float32)
    out_small = jax.block_until_ready(net_forward(x_small, params))
    assert out_small.shape == (8, 2)
    assert jnp.allclose(out_small, net_forward_matched_ref(x_small, params),
                        atol=2e-3), "mismatch vs bf16-matched reference (small)"
    assert jnp.allclose(out_small, net_forward_ref(x_small, params),
                        atol=2e-2), "mismatch vs f32 reference (small)"
    assert jnp.allclose(jnp.sum(out_small, axis=1), 1.0, atol=1e-5)

    print("KERNEL_OK")
</pallas_src>

<mosaic_0001>
module attributes {stable_mosaic.version = 11 : i64} {
  func.func @mlp_softmax_kernel(%arg0: i32, %arg1: memref<152x17xf32, #tpu.memory_space<vmem>>, %arg2: memref<17x128xbf16, #tpu.memory_space<vmem>>, %arg3: memref<1x128xf32, #tpu.memory_space<vmem>>, %arg4: memref<128x128xbf16, #tpu.memory_space<vmem>>, %arg5: memref<1x128xf32, #tpu.memory_space<vmem>>, %arg6: memref<128x128xbf16, #tpu.memory_space<vmem>>, %arg7: memref<1x128xf32, #tpu.memory_space<vmem>>, %arg8: memref<128x128xbf16, #tpu.memory_space<vmem>>, %arg9: memref<1x128xf32, #tpu.memory_space<vmem>>, %arg10: memref<152x2xf32, #tpu.memory_space<vmem>>) attributes {dimension_semantics = [#tpu.dimension_semantics<parallel>], iteration_bounds = array<i64: 2>, scalar_prefetch = 0 : i64, scratch_operands = 0 : i64, tpu.core_type = #tpu.core_type<tc>, window_params = [{transform_indices = @transform_0, window_bounds = array<i64: 152, 17>}, {pipeline_mode = #tpu.pipeline_mode<synchronous>, transform_indices = @transform_1, window_bounds = array<i64: 17, 128>}, {pipeline_mode = #tpu.pipeline_mode<synchronous>, transform_indices = @transform_2, window_bounds = array<i64: 1, 128>}, {pipeline_mode = #tpu.pipeline_mode<synchronous>, transform_indices = @transform_3, window_bounds = array<i64: 128, 128>}, {pipeline_mode = #tpu.pipeline_mode<synchronous>, transform_indices = @transform_4, window_bounds = array<i64: 1, 128>}, {pipeline_mode = #tpu.pipeline_mode<synchronous>, transform_indices = @transform_5, window_bounds = array<i64: 128, 128>}, {pipeline_mode = #tpu.pipeline_mode<synchronous>, transform_indices = @transform_6, window_bounds = array<i64: 1, 128>}, {pipeline_mode = #tpu.pipeline_mode<synchronous>, transform_indices = @transform_7, window_bounds = array<i64: 128, 128>}, {pipeline_mode = #tpu.pipeline_mode<synchronous>, transform_indices = @transform_8, window_bounds = array<i64: 1, 128>}, {transform_indices = @transform_9, window_bounds = array<i64: 152, 2>}]} {
    %c0 = arith.constant 0 : index
    %c0_0 = arith.constant 0 : index
    %0 = vector.load %arg1[%c0, %c0_0] : memref<152x17xf32, #tpu.memory_space<vmem>>, vector<152x17xf32>
    %1 = arith.truncf %0 : vector<152x17xf32> to vector<152x17xbf16>
    %c0_1 = arith.constant 0 : index
    %c0_2 = arith.constant 0 : index
    %2 = vector.load %arg2[%c0_1, %c0_2] : memref<17x128xbf16, #tpu.memory_space<vmem>>, vector<17x128xbf16>
    %cst = arith.constant dense<0.000000e+00> : vector<152x128xf32>
    %3 = tpu.matmul %1, %2, %cst {dimension_numbers = #tpu.dot_dimension_numbers<[1], [0], [0], [1], [0, 0, 1, 1], [], []>} : vector<152x17xbf16>, vector<17x128xbf16>, vector<152x128xf32> -> vector<152x128xf32>
    %c0_3 = arith.constant 0 : index
    %c0_4 = arith.constant 0 : index
    %4 = vector.load %arg3[%c0_3, %c0_4] : memref<1x128xf32, #tpu.memory_space<vmem>>, vector<1x128xf32>
    %5 = vector.broadcast %4 : vector<1x128xf32> to vector<152x128xf32>
    %6 = arith.addf %3, %5 : vector<152x128xf32>
    %cst_5 = arith.constant 0.000000e+00 : f32
    %7 = vector.broadcast %cst_5 : f32 to vector<152x128xf32>
    %8 = arith.maximumf %6, %7 : vector<152x128xf32>
    %9 = arith.truncf %8 : vector<152x128xf32> to vector<152x128xbf16>
    %c0_6 = arith.constant 0 : index
    %c0_7 = arith.constant 0 : index
    %10 = vector.load %arg4[%c0_6, %c0_7] : memref<128x128xbf16, #tpu.memory_space<vmem>>, vector<128x128xbf16>
    %cst_8 = arith.constant dense<0.000000e+00> : vector<152x128xf32>
    %11 = tpu.matmul %9, %10, %cst_8 {dimension_numbers = #tpu.dot_dimension_numbers<[1], [0], [0], [1], [0, 0, 1, 1], [], []>} : vector<152x128xbf16>, vector<128x128xbf16>, vector<152x128xf32> -> vector<152x128xf32>
    %c0_9 = arith.constant 0 : index
    %c0_10 = arith.constant 0 : index
    %12 = vector.load %arg5[%c0_9, %c0_10] : memref<1x128xf32, #tpu.memory_space<vmem>>, vector<1x128xf32>
    %13 = vector.broadcast %12 : vector<1x128xf32> to vector<152x128xf32>
    %14 = arith.addf %11, %13 : vector<152x128xf32>
    %cst_11 = arith.constant 0.000000e+00 : f32
    %15 = vector.broadcast %cst_11 : f32 to vector<152x128xf32>
    %16 = arith.maximumf %14, %15 : vector<152x128xf32>
    %17 = arith.truncf %16 : vector<152x128xf32> to vector<152x128xbf16>
    %c0_12 = arith.constant 0 : index
    %c0_13 = arith.constant 0 : index
    %18 = vector.load %arg6[%c0_12, %c0_13] : memref<128x128xbf16, #tpu.memory_space<vmem>>, vector<128x128xbf16>
    %cst_14 = arith.constant dense<0.000000e+00> : vector<152x128xf32>
    %19 = tpu.matmul %17, %18, %cst_14 {dimension_numbers = #tpu.dot_dimension_numbers<[1], [0], [0], [1], [0, 0, 1, 1], [], []>} : vector<152x128xbf16>, vector<128x128xbf16>, vector<152x128xf32> -> vector<152x128xf32>
    %c0_15 = arith.constant 0 : index
    %c0_16 = arith.constant 0 : index
    %20 = vector.load %arg7[%c0_15, %c0_16] : memref<1x128xf32, #tpu.memory_space<vmem>>, vector<1x128xf32>
    %21 = vector.broadcast %20 : vector<1x128xf32> to vector<152x128xf32>
    %22 = arith.addf %19, %21 : vector<152x128xf32>
    %cst_17 = arith.constant 0.000000e+00 : f32
    %23 = vector.broadcast %cst_17 : f32 to vector<152x128xf32>
    %24 = arith.maximumf %22, %23 : vector<152x128xf32>
    %25 = arith.truncf %24 : vector<152x128xf32> to vector<152x128xbf16>
    %c0_18 = arith.constant 0 : index
    %c0_19 = arith.constant 0 : index
    %26 = vector.load %arg8[%c0_18, %c0_19] : memref<128x128xbf16, #tpu.memory_space<vmem>>, vector<128x128xbf16>
    %cst_20 = arith.constant dense<0.000000e+00> : vector<152x128xf32>
    %27 = tpu.matmul %25, %26, %cst_20 {dimension_numbers = #tpu.dot_dimension_numbers<[1], [0], [0], [1], [0, 0, 1, 1], [], []>} : vector<152x128xbf16>, vector<128x128xbf16>, vector<152x128xf32> -> vector<152x128xf32>
    %c0_21 = arith.constant 0 : index
    %c0_22 = arith.constant 0 : index
    %28 = vector.load %arg9[%c0_21, %c0_22] : memref<1x128xf32, #tpu.memory_space<vmem>>, vector<1x128xf32>
    %29 = vector.broadcast %28 : vector<1x128xf32> to vector<152x128xf32>
    %30 = arith.addf %27, %29 : vector<152x128xf32>
    %31 = vector.extract_strided_slice %30 {offsets = [0, 0], sizes = [152, 2], strides = [1, 1]} : vector<152x128xf32> to vector<152x2xf32>
    %cst_23 = arith.constant 5.000000e-01 : f32
    %32 = vector.broadcast %cst_23 : f32 to vector<152x2xf32>
    %33 = arith.mulf %32, %31 : vector<152x2xf32>
    %34 = math.tanh %33 : vector<152x2xf32>
    %cst_24 = arith.constant 1.000000e+00 : f32
    %35 = vector.broadcast %cst_24 : f32 to vector<152x2xf32>
    %36 = arith.addf %35, %34 : vector<152x2xf32>
    %cst_25 = arith.constant 5.000000e-01 : f32
    %37 = vector.broadcast %cst_25 : f32 to vector<152x2xf32>
    %38 = arith.mulf %37, %36 : vector<152x2xf32>
    %39 = tpu.iota {dimensions = array<i32: 1>} : vector<152x2xi32>
    %c0_i32 = arith.constant 0 : i32
    %40 = vector.broadcast %c0_i32 : i32 to vector<152x2xi32>
    %41 = arith.cmpi eq, %39, %40 : vector<152x2xi32>
    %cst_26 = arith.constant 1.000000e+00 : f32
    %42 = vector.broadcast %cst_26 : f32 to vector<152x2xf32>
    %43 = arith.subf %42, %38 : vector<152x2xf32>
    %44 = arith.select %41, %43, %38 : vector<152x2xi1>, vector<152x2xf32>
    %c0_27 = arith.constant 0 : index
    %c0_28 = arith.constant 0 : index
    %45 = vector.load %arg10[%c0_27, %c0_28] : memref<152x2xf32, #tpu.memory_space<vmem>>, vector<152x2xf32>
    tpu.vector_store %arg10[%c0_27, %c0_28], %44 {strides = array<i32>} : memref<152x2xf32, #tpu.memory_space<vmem>>, vector<152x2xf32>,
    return
  }
  func.func @transform_0(%arg0: i32) -> (i32, i32) {
    %c0_i32 = arith.constant 0 : i32
    %c0_i32_0 = arith.constant 0 : i32
    return %arg0, %c0_i32 : i32, i32
  }
  func.func @transform_1(%arg0: i32) -> (i32, i32) {
    %c0_i32 = arith.constant 0 : i32
    %c0_i32_0 = arith.constant 0 : i32
    %c0_i32_1 = arith.constant 0 : i32
    return %c0_i32, %c0_i32_0 : i32, i32
  }
  func.func @transform_2(%arg0: i32) -> (i32, i32) {
    %c0_i32 = arith.constant 0 : i32
    %c0_i32_0 = arith.constant 0 : i32
    %c0_i32_1 = arith.constant 0 : i32
    return %c0_i32, %c0_i32_0 : i32, i32
  }
  func.func @transform_3(%arg0: i32) -> (i32, i32) {
    %c0_i32 = arith.constant 0 : i32
    %c0_i32_0 = arith.constant 0 : i32
    %c0_i32_1 = arith.constant 0 : i32
    return %c0_i32, %c0_i32_0 : i32, i32
  }
  func.func @transform_4(%arg0: i32) -> (i32, i32) {
    %c0_i32 = arith.constant 0 : i32
    %c0_i32_0 = arith.constant 0 : i32
    %c0_i32_1 = arith.constant 0 : i32
    return %c0_i32, %c0_i32_0 : i32, i32
  }
  func.func @transform_5(%arg0: i32) -> (i32, i32) {
    %c0_i32 = arith.constant 0 : i32
    %c0_i32_0 = arith.constant 0 : i32
    %c0_i32_1 = arith.constant 0 : i32
    return %c0_i32, %c0_i32_0 : i32, i32
  }
  func.func @transform_6(%arg0: i32) -> (i32, i32) {
    %c0_i32 = arith.constant 0 : i32
    %c0_i32_0 = arith.constant 0 : i32
    %c0_i32_1 = arith.constant 0 : i32
    return %c0_i32, %c0_i32_0 : i32, i32
  }
  func.func @transform_7(%arg0: i32) -> (i32, i32) {
    %c0_i32 = arith.constant 0 : i32
    %c0_i32_0 = arith.constant 0 : i32
    %c0_i32_1 = arith.constant 0 : i32
    return %c0_i32, %c0_i32_0 : i32, i32
  }
  func.func @transform_8(%arg0: i32) -> (i32, i32) {
    %c0_i32 = arith.constant 0 : i32
    %c0_i32_0 = arith.constant 0 : i32
    %c0_i32_1 = arith.constant 0 : i32
    return %c0_i32, %c0_i32_0 : i32, i32
  }
  func.func @transform_9(%arg0: i32) -> (i32, i32) {
    %c0_i32 = arith.constant 0 : i32
    %c0_i32_0 = arith.constant 0 : i32
    return %arg0, %c0_i32 : i32, i32
  }
}

</mosaic_0001>

<bundles_post_ra>
// kernel: net_forward.1
= control target key start
LH: loop header
LB: loop body
LE: loop exit
PB: predicated region body
PF: predicated region fallthrough
CT: control target
= control target key end

     0   :  { %s1758_s30 = smov 0   ;;  %s2086_s0 = inlined_call_operand.vmem [shape: f32[304,17], index: 0, kind: input, shape index: {}]   ;;  %s2087_s1 = inlined_call_operand.vmem [shape: bf16[17,128], index: 1, kind: input, shape index: {}]   ;;  %s2088_s2 = inlined_call_operand.vmem [shape: f32[1,128], index: 2, kind: input, shape index: {}]   ;;  %s2089_s3 = inlined_call_operand.vmem [shape: bf16[128,128], index: 3, kind: input, shape index: {}]   ;;  %s2090_s4 = inlined_call_operand.vmem [shape: f32[1,128], index: 4, kind: input, shape index: {}]   ;;  %s2091_s5 = inlined_call_operand.vmem [shape: bf16[128,128], index: 5, kind: input, shape index: {}]   ;;  %s2092_s6 = inlined_call_operand.vmem [shape: f32[1,128], index: 6, kind: input, shape index: {}]   ;;  %s2093_s7 = inlined_call_operand.vmem [shape: bf16[128,128], index: 7, kind: input, shape index: {}]   ;;  %s2094_s8 = inlined_call_operand.vmem [shape: f32[1,128], index: 8, kind: input, shape index: {}]   ;;  %s2095_s9 = inlined_call_operand.vmem [shape: f32[304,2], index: 9, kind: output, shape index: {}]  }
   0x1 LB: > { %s1363_s10 = sadd.s32 4294967295, %s1705_s30   ;;  %p1367_p0 = scmp.ge.s32.totalorder %s1705_s30, 1  ;;  %s1705_s30 = sphi %s1758_s30, %s19_s30  }
   0x2   : > { %p288_p1 = scmp.lt.s32.totalorder %s1705_s30, 3 }
   0x4   : > { %p289_p2 = pnand %p1367_p0, %p288_p1 }
   0x5   : > { %v1635_v0 = vld [vmem:[%s2087_s1] sm:$0xff] (!%p289_p2)   ;;  %vm416_vm0 = vcmask (!%p289_p2), 1040384   ;;  %v1636_v1 = vld [vmem:[%s2087_s1 + $0x8] ss:$0 sps:$4 sm:$0x11] (!%p289_p2)   ;;  %v1707_v2 = vmov (!%p289_p2), 0  }
   0x6   : > { %292 = sbr.rel (%p289_p2) target bundleno = 956 (0x3bc), region = 56  ;;  %1478 = vmatprep.subr.bf16.mxu0 (!%p289_p2), %v1635_v0  ;;  %v418_v3 = vsel (!%p289_p2), %vm416_vm0, 65535, %v1707_v2  ;;  %v1637_v4 = vld [vmem:[%s2089_s3] sm:$0xff] (!%p289_p2)   ;;  %v1638_v6 = vld [vmem:[%s2089_s3 + $0x8] sm:$0xff] (!%p289_p2)   ;;  %v1639_v7 = vld [vmem:[%s2089_s3 + $0x10] sm:$0xff] (!%p289_p2)   ;;  %vm385_vm1 = vcmask (!%p289_p2), 138240  }
   0x7   : > { %s324_s15 = smul.u32 (!%p289_p2), 19, %s1363_s10  ;;  %1479 = vmatpush3.bf16.msra.mxu0 (!%p289_p2), %v1635_v0  ;;  %v420_v5 = vand.u32 (!%p289_p2), %v1636_v1, %v418_v3  ;;  %1502 = vmatprep.subr.bf16.mxu1 (!%p289_p2), %v1637_v4  ;;  %v1640_v8 = vld [vmem:[%s2089_s3 + $0x18] sm:$0xff] (!%p289_p2)   ;;  %v1641_v18 = vld [vmem:[%s2089_s3 + $0x20] sm:$0xff] (!%p289_p2)   ;;  %v1642_v23 = vld [vmem:[%s2089_s3 + $0x28] sm:$0xff] (!%p289_p2)   ;;  %vm1287_vm3 = vcmask (!%p289_p2), 15360  }
   0x8   : > { %1503 = vmatpush3.bf16.msra.mxu1 (!%p289_p2), %v1637_v4  ;;  %v1643_v40 = vld [vmem:[%s2089_s3 + $0x30] sm:$0xff] (!%p289_p2)   ;;  %v1644_v41 = vld [vmem:[%s2089_s3 + $0x38] sm:$0xff] (!%p289_p2)   ;;  %v1645_v42 = vld [vmem:[%s2091_s5] sm:$0xff] (!%p289_p2)  }
   0x9   : > { %p325_p3 = scmp.lt.s32.totalorder (!%p289_p2), %s324_s15, 37  ;;  %1480 = vmatprep.subr.bf16.mxu0 (!%p289_p2), %v420_v5  ;;  %1504 = vmatprep.subr.bf16.mxu1 (!%p289_p2), %v1638_v6  ;;  %v1646_v43 = vld [vmem:[%s2091_s5 + $0x8] sm:$0xff] (!%p289_p2)   ;;  %v1647_v44 = vld [vmem:[%s2091_s5 + $0x10] sm:$0xff] (!%p289_p2)   ;;  %v1648_v45 = vld [vmem:[%s2091_s5 + $0x18] sm:$0xff] (!%p289_p2)  }
   0xa   : > { %v1649_v46 = vld [vmem:[%s2091_s5 + $0x20] sm:$0xff] (!%p289_p2)   ;;  %v1650_v47 = vld [vmem:[%s2091_s5 + $0x28] sm:$0xff] (!%p289_p2)  }
   0xb   : > { %1481 = vmatpush3.bf16.msra.mxu0 (!%p289_p2), %v420_v5  ;;  %v1856_v48 = vld [vmem:[%s2088_s2] ss:$0 sm:$0xff] (!%p289_p2) }
   0xc   : > { %1505 = vmatpush3.bf16.msra.mxu1 (!%p289_p2), %v1638_v6  ;;  %1538 = vmatprep.subr.bf16.mxu0 (!%p289_p2), %v1645_v42 }
   0xd   : > { %s2097_s15 = smov (!%p325_p3, %s324_s15), 37  ;;  %1506 = vmatprep.subr.bf16.mxu1 %v1639_v7 }
   0xe   : > { %s1368_s22 = sshll.u32 %s2097_s15, 3 }
   0xf   : > { %s1792_s27 = scalar_lea.vmem %s2086_s0, %s1368_s22  ;;  %s1997_s24 = scalar_lea.vmem %s2095_s9, %s1368_s22 }
  0x10   : > { %v337_v9 = vld [vmem:[%s1792_s27] sm:$0xff]  ;;  %v338_v10 = vld [vmem:[%s1792_s27 + $0x8] sm:$0xff]  ;;  %v339_v11 = vld [vmem:[%s1792_s27 + $0x10] sm:$0xff]  ;;  %1507 = vmatpush3.bf16.msra.mxu1 %v1639_v7 }
  0x11   : > { %v356_v12 = vpack.c.bf16 %v338_v10, %v337_v9  ;;  %v340_v13 = vld [vmem:[%s1792_s27 + $0x18] sm:$0xff]  ;;  %v341_v14 = vld [vmem:[%s1792_s27 + $0x20] sm:$0xff]  ;;  %v342_v15 = vld [vmem:[%s1792_s27 + $0x28] sm:$0xff]  ;;  %1508 = vmatprep.subr.bf16.mxu1 %v1640_v8 }
  0x12   : > { %v357_v16 = vpack.c.bf16 %v340_v13, %v339_v11  ;;  %v358_v17 = vpack.c.bf16 %v342_v15, %v341_v14  ;;  %v343_v19 = vld [vmem:[%s1792_s27 + $0x30] sm:$0xff]  ;;  %v344_v20 = vld [vmem:[%s1792_s27 + $0x38] sm:$0xff]  ;;  %v345_v21 = vld [vmem:[%s1792_s27 + $0x40] sm:$0xff] }
  0x13   : > { %1482 = vmatprep.mubr.msk.bf16.mxu0 %vm385_vm1, %v356_v12  ;;  %v346_v22 = vld [vmem:[%s1792_s27 + $0x48] sm:$0xff]  ;;  %v359_v24 = vpack.c.bf16 %v344_v20, %v343_v19  ;;  %v347_v26 = vld [vmem:[%s1792_s27 + $0x50] sm:$0xff]  ;;  %v348_v27 = vld [vmem:[%s1792_s27 + $0x58] sm:$0xff] }
  0x14   : > { %1483 = vmatmul.mubr.msk.bf16.vlgmr.msra.gmra.mrb[0].mxu0 %vm385_vm1, %v357_v16  ;;  %1509 = vmatpush3.bf16.msra.mxu1 %v1640_v8  ;;  %v360_v25 = vpack.c.bf16 %v346_v22, %v345_v21  ;;  %v349_v28 = vld [vmem:[%s1792_s27 + $0x60] sm:$0xff]  ;;  %v350_v29 = vld [vmem:[%s1792_s27 + $0x68] sm:$0xff]  ;;  %v361_v30 = vpack.c.bf16 %v348_v27, %v347_v26  ;;  %v351_v32 = vld [vmem:[%s1792_s27 + $0x70] sm:$0xff] }
  0x15   : > { %1486 = vmatprep.mubr.msk.bf16.mxu0 %vm385_vm1, %v358_v17  ;;  %1510 = vmatprep.subr.bf16.mxu1 %v1641_v18  ;;  %v362_v31 = vpack.c.bf16 %v350_v29, %v349_v28  ;;  %v352_v33 = vld [vmem:[%s1792_s27 + $0x78] sm:$0xff]  ;;  %v353_v34 = vld [vmem:[%s1792_s27 + $0x80] sm:$0xff]  ;;  %v354_v35 = vld [vmem:[%s1792_s27 + $0x88] sm:$0xff] }
  0x16   : > { %v363_v36 = vpack.c.bf16 %v352_v33, %v351_v32  ;;  %v364_v37 = vpack.c.bf16 %v354_v35, %v353_v34  ;;  %v355_v38 = vld [vmem:[%s1792_s27 + $0x90] sm:$0xff]  ;;  %1539 = vmatpush3.bf16.msra.mxu0 %v1645_v42 }
  0x17   : > { %v365_v39 = vpack.c.bf16 %v355_v38, %v355_v38  ;;  %1540 = vmatprep.subr.bf16.mxu0 %v1646_v43 }
  0x18   : > { %1511 = vmatpush3.bf16.msra.mxu1 %v1641_v18 }
  0x19   : > { %1512 = vmatprep.subr.bf16.mxu1 %v1642_v23 }
  0x1a   : > { %1541 = vmatpush3.bf16.msra.mxu0 %v1646_v43 }
  0x1b   : > { %1542 = vmatprep.subr.bf16.mxu0 %v1647_v44 }
  0x1c   : > { %1487 = vmatmul.mubr.msk.bf16.gmra.mrb[4].mxu0 %vm385_vm1, %v359_v24  ;;  %1513 = vmatpush3.bf16.msra.mxu1 %v1642_v23 }
  0x1d   : > { %1490 = vmatprep.mubr.msk.bf16.mxu0 %vm385_vm1, %v360_v25  ;;  %1514 = vmatprep.subr.bf16.mxu1 %v1643_v40 }
  0x1e   : > { %1543 = vmatpush3.bf16.msra.mxu0 %v1647_v44 }
  0x1f   : > { %1544 = vmatprep.subr.bf16.mxu0 %v1648_v45 }
  0x20   : > { %1515 = vmatpush3.bf16.msra.mxu1 %v1643_v40 }
  0x21   : > { %1516 = vmatprep.subr.bf16.mxu1 %v1644_v41 }
  0x22   : > { %1545 = vmatpush3.bf16.msra.mxu0 %v1648_v45 }
  0x23   : > { %1546 = vmatprep.subr.bf16.mxu0 %v1649_v46 }
  0x24   : > { %1491 = vmatmul.mubr.msk.bf16.gmra.mrb[8].mxu0 %vm385_vm1, %v361_v30  ;;  %1517 = vmatpush3.bf16.msra.mxu1 %v1644_v41 }
  0x25   : > { %1494 = vmatprep.mubr.msk.bf16.mxu0 %vm385_vm1, %v362_v31 }
  0x26   : > { %1547 = vmatpush3.bf16.msra.mxu0 %v1649_v46 }
  0x27   : > { %1548 = vmatprep.subr.bf16.mxu0 %v1650_v47 }
  0x2a   : > { %1549 = vmatpush3.bf16.msra.mxu0 %v1650_v47 }
  0x2c   : > { %1495 = vmatmul.mubr.msk.bf16.gmra.mrb[12].mxu0 %vm385_vm1, %v363_v36 }
  0x2d   : > { %1498 = vmatprep.mubr.msk.bf16.mxu0 %vm385_vm1, %v364_v37 }
  0x34   : > { %1499 = vmatmul.mubr.msk.bf16.gmra.mrb[16].mxu0 %vm385_vm1, %v365_v39 }
  0xe7   : > { %v1484_v49 = vpop.f32.mrb[0].mxu0 }
  0xe8   : > { %v465_v50 = vadd.f32 %v1484_v49, %v1856_v48  ;;  %v456_v51 = vpop.f32.mrb[1].mxu0 }
  0xe9   : > { %v457_v52 = vadd.f32 %v1856_v48, %v456_v51  ;;  %v1485_v53 = vpop.f32.mrb[2].mxu0 }
  0xea   : > { %v468_v54 = vadd.f32 %v1485_v53, %v1856_v48  ;;  %v459_v55 = vpop.f32.mrb[3].mxu0  ;;  %v536_v57 = vmax.f32 %v465_v50, 0.0 }
  0xeb   : > { %v460_v56 = vadd.f32 %v1856_v48, %v459_v55  ;;  %v534_v59 = vmax.f32 %v457_v52, 0.0  ;;  %v1652_v55 = vld [vmem:[%s2091_s5 + $0x38] sm:$0xff]  }
  0xec   : > { %v537_v58 = vmax.f32 %v468_v54, 0.0  ;;  %v1651_v54 = vld [vmem:[%s2091_s5 + $0x30] sm:$0xff]  }
  0xed   : > { %v535_v60 = vmax.f32 %v460_v56, 0.0  ;;  %1550 = vmatprep.subr.bf16.mxu0 %v1651_v54  ;;  %v1654_v56 = vld [vmem:[%s2093_s7 + $0x8] sm:$0xff]  }
  0xee   : > { %v554_v61 = vpack.c.bf16 %v537_v58, %v536_v57  ;;  %1551 = vmatpush3.bf16.msra.mxu0 %v1651_v54  ;;  %v1655_v57 = vld [vmem:[%s2093_s7 + $0x10] sm:$0xff]   ;;  %v1895_v58 = vld [vmem:[%s2093_s7 + $0x18] sm:$0xff]  }
  0xef   : > { %v1488_v62 = vpop.f32.mrb[4].mxu0  ;;  %v553_v63 = vpack.c.bf16 %v535_v60, %v534_v59  ;;  %1552 = vmatprep.subr.bf16.mxu0 %v1652_v55  ;;  %v1901_v59 = vld [vmem:[%s2093_s7 + $0x20] sm:$0xff]   ;;  %v1908_v60 = vld [vmem:[%s2093_s7 + $0x28] sm:$0xff]  }
  0xf0   : > { %v481_v0 = vadd.f32 %v1488_v62, %v1856_v48  ;;  %v472_v1 = vpop.f32.mrb[5].mxu0 }
  0xf1   : > { %v473_v2 = vadd.f32 %v1856_v48, %v472_v1  ;;  %v1489_v3 = vpop.f32.mrb[6].mxu0  ;;  %1518 = vmatprep.mubr.bf16.mxu1 %v553_v63 }
  0xf2   : > { %v484_v4 = vadd.f32 %v1489_v3, %v1856_v48  ;;  %v475_v5 = vpop.f32.mrb[7].mxu0  ;;  %1519 = vmatmul.mubr.bf16.vlgmr.msra.gmra.mrb[0].mxu1 %v554_v61  ;;  %v540_v7 = vmax.f32 %v481_v0, 0.0  ;;  %1553 = vmatpush3.bf16.msra.mxu0 %v1652_v55  ;;  %v1916_v61 = vld [vmem:[%s2090_s4] ss:$0 sm:$0xff] }
  0xf3   : > { %v476_v6 = vadd.f32 %v1856_v48, %v475_v5  ;;  %v538_v9 = vmax.f32 %v473_v2, 0.0 }
  0xf4   : > { %v541_v8 = vmax.f32 %v484_v4, 0.0 }
  0xf5   : > { %v539_v10 = vmax.f32 %v476_v6, 0.0 }
  0xf6   : > { %v556_v11 = vpack.c.bf16 %v541_v8, %v540_v7 }
  0xf7   : > { %v555_v12 = vpack.c.bf16 %v539_v10, %v538_v9  ;;  %v1492_v13 = vpop.f32.mrb[8].mxu0 }
  0xf8   : > { %v497_v14 = vadd.f32 %v1492_v13, %v1856_v48  ;;  %v488_v15 = vpop.f32.mrb[9].mxu0 }
  0xf9   : > { %v489_v16 = vadd.f32 %v1856_v48, %v488_v15  ;;  %v1493_v17 = vpop.f32.mrb[10].mxu0  ;;  %1522 = vmatprep.mubr.bf16.mxu1 %v555_v12 }
  0xfa   : > { %v500_v18 = vadd.f32 %v1493_v17, %v1856_v48  ;;  %v491_v19 = vpop.f32.mrb[11].mxu0  ;;  %1523 = vmatmul.mubr.bf16.gmra.mrb[4].mxu1 %v556_v11  ;;  %v544_v21 = vmax.f32 %v497_v14, 0.0 }
  0xfb   : > { %v492_v20 = vadd.f32 %v1856_v48, %v491_v19  ;;  %v542_v23 = vmax.f32 %v489_v16, 0.0 }
  0xfc   : > { %v545_v22 = vmax.f32 %v500_v18, 0.0 }
  0xfd   : > { %v543_v24 = vmax.f32 %v492_v20, 0.0 }
  0xfe   : > { %v558_v25 = vpack.c.bf16 %v545_v22, %v544_v21 }
  0xff   : > { %v557_v26 = vpack.c.bf16 %v543_v24, %v542_v23  ;;  %v1496_v27 = vpop.f32.mrb[12].mxu0 }
 0x100   : > { %v513_v28 = vadd.f32 %v1496_v27, %v1856_v48  ;;  %v504_v29 = vpop.f32.mrb[13].mxu0 }
 0x101   : > { %v505_v30 = vadd.f32 %v1856_v48, %v504_v29  ;;  %v1497_v31 = vpop.f32.mrb[14].mxu0  ;;  %1526 = vmatprep.mubr.bf16.mxu1 %v557_v26 }
 0x102   : > { %v516_v32 = vadd.f32 %v1497_v31, %v1856_v48  ;;  %v507_v33 = vpop.f32.mrb[15].mxu0  ;;  %1527 = vmatmul.mubr.bf16.gmra.mrb[8].mxu1 %v558_v25  ;;  %v548_v35 = vmax.f32 %v513_v28, 0.0 }
 0x103   : > { %v508_v34 = vadd.f32 %v1856_v48, %v507_v33  ;;  %v546_v37 = vmax.f32 %v505_v30, 0.0 }
 0x104   : > { %v549_v36 = vmax.f32 %v516_v32, 0.0 }
 0x105   : > { %v547_v38 = vmax.f32 %v508_v34, 0.0 }
 0x106   : > { %v560_v39 = vpack.c.bf16 %v549_v36, %v548_v35 }
 0x107   : > { %v559_v40 = vpack.c.bf16 %v547_v38, %v546_v37  ;;  %v1500_v41 = vpop.f32.mrb[16].mxu0 }
 0x108   : > { %v529_v42 = vadd.f32 %v1500_v41, %v1856_v48  ;;  %v520_v43 = vpop.f32.mrb[17].mxu0 }
 0x109   : > { %v521_v44 = vadd.f32 %v1856_v48, %v520_v43  ;;  %v1501_v45 = vpop.f32.mrb[18].mxu0  ;;  %1530 = vmatprep.mubr.bf16.mxu1 %v559_v40 }
 0x10a   : > { %v523_v46 = vpop.f32.mrb[19].mxu0  ;;  %1531 = vmatmul.mubr.bf16.gmra.mrb[12].mxu1 %v560_v39  ;;  %v552_v49 = vmax.f32 %v529_v42, 0.0 }
 0x10b   : > { %v524_v47 = vadd.f32 %v1856_v48, %v523_v46  ;;  %v550_v50 = vmax.f32 %v521_v44, 0.0  ;;  %v1653_v48 = vld [vmem:[%s2093_s7] sm:$0xff]  }
 0x10c   : > { %v562_v53 = vpack.c.bf16 %v552_v49, %v552_v49  ;;  %1610 = vmatprep.subr.bf16.mxu1 %v1653_v48  ;;  %1574 = vmatprep.subr.bf16.mxu0 %v1653_v48 }
 0x10d   : > { %v551_v51 = vmax.f32 %v524_v47, 0.0  ;;  %1618 = vmatpush3.bf16.msra.mxu1 %v1653_v48 }
 0x10e   : > { %1611 = vmatprep.subr.bf16.mxu1 %v1654_v56 }
 0x10f   : > { %v561_v52 = vpack.c.bf16 %v551_v51, %v550_v50 }
 0x111   : > { %1534 = vmatprep.mubr.bf16.mxu1 %v561_v52  ;;  %1619 = vmatpush3.bf16.msra.mxu1 %v1654_v56 }
 0x112   : > { %1535 = vmatmul.mubr.bf16.gmra.mrb[16].mxu1 %v562_v53  ;;  %1612 = vmatprep.subr.bf16.mxu1 %v1655_v57 }
 0x115   : > { %1620 = vmatpush3.bf16.msra.mxu1 %v1655_v57 }
 0x116   : > { %1613 = vmatprep.subr.bf16.mxu1 %v1895_v58 }
 0x119   : > { %1621 = vmatpush3.bf16.msra.mxu1 %v1895_v58 }
 0x11a   : > { %1614 = vmatprep.subr.bf16.mxu1 %v1901_v59 }
 0x11d   : > { %1622 = vmatpush3.bf16.msra.mxu1 %v1901_v59 }
 0x11e   : > { %1615 = vmatprep.subr.bf16.mxu1 %v1908_v60 }
 0x121   : > { %1623 = vmatpush3.bf16.msra.mxu1 %v1908_v60 }
 0x1c5   : > { %v1520_v62 = vpop.f32.mrb[0].mxu1 }
 0x1c6   : > { %v677_v63 = vadd.f32 %v1520_v62, %v1916_v61  ;;  %v668_v0 = vpop.f32.mrb[1].mxu1 }
 0x1c7   : > { %v669_v1 = vadd.f32 %v1916_v61, %v668_v0  ;;  %v1521_v2 = vpop.f32.mrb[2].mxu1 }
 0x1c8   : > { %v680_v3 = vadd.f32 %v1521_v2, %v1916_v61  ;;  %v671_v4 = vpop.f32.mrb[3].mxu1  ;;  %v748_v6 = vmax.f32 %v677_v63, 0.0 }
 0x1c9   : > { %v672_v5 = vadd.f32 %v1916_v61, %v671_v4  ;;  %v746_v8 = vmax.f32 %v669_v1, 0.0  ;;  %v1660_v4 = vld [vmem:[%s2093_s7 + $0x38] sm:$0xff]  }
 0x1ca   : > { %v749_v7 = vmax.f32 %v680_v3, 0.0 }
 0x1cb   : > { %v747_v9 = vmax.f32 %v672_v5, 0.0 }
 0x1cc   : > { %v766_v10 = vpack.c.bf16 %v749_v7, %v748_v6 }
 0x1cd   : > { %v765_v11 = vpack.c.bf16 %v747_v9, %v746_v8  ;;  %v1524_v12 = vpop.f32.mrb[4].mxu1 }
 0x1ce   : > { %v693_v13 = vadd.f32 %v1524_v12, %v1916_v61  ;;  %v684_v14 = vpop.f32.mrb[5].mxu1 }
 0x1cf   : > { %v685_v15 = vadd.f32 %v1916_v61, %v684_v14  ;;  %v1525_v16 = vpop.f32.mrb[6].mxu1  ;;  %1554 = vmatprep.mubr.bf16.mxu0 %v765_v11 }
 0x1d0   : > { %v696_v17 = vadd.f32 %v1525_v16, %v1916_v61  ;;  %v687_v18 = vpop.f32.mrb[7].mxu1  ;;  %1555 = vmatmul.mubr.bf16.vlgmr.msra.gmra.mrb[20].mxu0 %v766_v10  ;;  %v752_v20 = vmax.f32 %v693_v13, 0.0 }
 0x1d1   : > { %v688_v19 = vadd.f32 %v1916_v61, %v687_v18  ;;  %1575 = vmatpush3.bf16.msra.mxu0 %v1653_v48  ;;  %v750_v22 = vmax.f32 %v685_v15, 0.0 }
 0x1d2   : > { %v753_v21 = vmax.f32 %v696_v17, 0.0  ;;  %1576 = vmatprep.subr.bf16.mxu0 %v1654_v56 }
 0x1d3   : > { %v751_v23 = vmax.f32 %v688_v19, 0.0 }
 0x1d4   : > { %v768_v24 = vpack.c.bf16 %v753_v21, %v752_v20 }
 0x1d5   : > { %v767_v25 = vpack.c.bf16 %v751_v23, %v750_v22  ;;  %v1528_v26 = vpop.f32.mrb[8].mxu1  ;;  %1577 = vmatpush3.bf16.msra.mxu0 %v1654_v56 }
 0x1d6   : > { %v709_v27 = vadd.f32 %v1528_v26, %v1916_v61  ;;  %v700_v28 = vpop.f32.mrb[9].mxu1  ;;  %1578 = vmatprep.subr.bf16.mxu0 %v1655_v57 }
 0x1d7   : > { %v701_v29 = vadd.f32 %v1916_v61, %v700_v28  ;;  %v1529_v30 = vpop.f32.mrb[10].mxu1  ;;  %1558 = vmatprep.mubr.bf16.mxu0 %v767_v25 }
 0x1d8   : > { %v712_v31 = vadd.f32 %v1529_v30, %v1916_v61  ;;  %v703_v32 = vpop.f32.mrb[11].mxu1  ;;  %1559 = vmatmul.mubr.bf16.gmra.mrb[24].mxu0 %v768_v24  ;;  %v756_v34 = vmax.f32 %v709_v27, 0.0 }
 0x1d9   : > { %v704_v33 = vadd.f32 %v1916_v61, %v703_v32  ;;  %1579 = vmatpush3.bf16.msra.mxu0 %v1655_v57  ;;  %v754_v36 = vmax.f32 %v701_v29, 0.0 }
 0x1da   : > { %v757_v35 = vmax.f32 %v712_v31, 0.0  ;;  %1580 = vmatprep.subr.bf16.mxu0 %v1895_v58 }
 0x1db   : > { %v755_v37 = vmax.f32 %v704_v33, 0.0 }
 0x1dc   : > { %v770_v38 = vpack.c.bf16 %v757_v35, %v756_v34 }
 0x1dd   : > { %v769_v39 = vpack.c.bf16 %v755_v37, %v754_v36  ;;  %v1532_v40 = vpop.f32.mrb[12].mxu1  ;;  %1581 = vmatpush3.bf16.msra.mxu0 %v1895_v58 }
 0x1de   : > { %v725_v41 = vadd.f32 %v1532_v40, %v1916_v61  ;;  %v716_v42 = vpop.f32.mrb[13].mxu1  ;;  %1582 = vmatprep.subr.bf16.mxu0 %v1901_v59 }
 0x1df   : > { %v717_v43 = vadd.f32 %v1916_v61, %v716_v42  ;;  %v1533_v44 = vpop.f32.mrb[14].mxu1  ;;  %1562 = vmatprep.mubr.bf16.mxu0 %v769_v39 }
 0x1e0   : > { %v728_v45 = vadd.f32 %v1533_v44, %v1916_v61  ;;  %v719_v46 = vpop.f32.mrb[15].mxu1  ;;  %1563 = vmatmul.mubr.bf16.gmra.mrb[28].mxu0 %v770_v38  ;;  %v760_v49 = vmax.f32 %v725_v41, 0.0 }
 0x1e1   : > { %v720_v47 = vadd.f32 %v1916_v61, %v719_v46  ;;  %1583 = vmatpush3.bf16.msra.mxu0 %v1901_v59  ;;  %v758_v51 = vmax.f32 %v717_v43, 0.0 }
 0x1e2   : > { %v761_v50 = vmax.f32 %v728_v45, 0.0  ;;  %1584 = vmatprep.subr.bf16.mxu0 %v1908_v60 }
 0x1e3   : > { %v759_v52 = vmax.f32 %v720_v47, 0.0 }
 0x1e4   : > { %v772_v53 = vpack.c.bf16 %v761_v50, %v760_v49 }
 0x1e5   : > { %v771_v54 = vpack.c.bf16 %v759_v52, %v758_v51  ;;  %v1536_v55 = vpop.f32.mrb[16].mxu1  ;;  %1585 = vmatpush3.bf16.msra.mxu0 %v1908_v60  ;;  %v1659_v60 = vld [vmem:[%s2093_s7 + $0x30] sm:$0xff]  }
 0x1e6   : > { %v741_v48 = vadd.f32 %v1536_v55, %v1916_v61  ;;  %v732_v56 = vpop.f32.mrb[17].mxu1  ;;  %1586 = vmatprep.subr.bf16.mxu0 %v1659_v60  ;;  %1616 = vmatprep.subr.bf16.mxu1 %v1659_v60 }
 0x1e7   : > { %v733_v57 = vadd.f32 %v1916_v61, %v732_v56  ;;  %v1537_v58 = vpop.f32.mrb[18].mxu1  ;;  %1566 = vmatprep.mubr.bf16.mxu0 %v771_v54  ;;  %1624 = vmatpush3.bf16.msra.mxu1 %v1659_v60 }
 0x1e8   : > { %v735_v62 = vpop.f32.mrb[19].mxu1  ;;  %1567 = vmatmul.mubr.bf16.gmra.mrb[32].mxu0 %v772_v53  ;;  %v764_v63 = vmax.f32 %v741_v48, 0.0  ;;  %1617 = vmatprep.subr.bf16.mxu1 %v1660_v4 }
 0x1e9   : > { %v736_v59 = vadd.f32 %v1916_v61, %v735_v62  ;;  %v762_v0 = vmax.f32 %v733_v57, 0.0  ;;  %1587 = vmatpush3.bf16.msra.mxu0 %v1659_v60  ;;  %v1952_v61 = vld [vmem:[%s2092_s6] ss:$0 sm:$0xff] }
 0x1ea   : > { %v774_v3 = vpack.c.bf16 %v764_v63, %v764_v63  ;;  %1588 = vmatprep.subr.bf16.mxu0 %v1660_v4 }
 0x1eb   : > { %v763_v1 = vmax.f32 %v736_v59, 0.0  ;;  %1625 = vmatpush3.bf16.msra.mxu1 %v1660_v4 }
 0x1ed   : > { %v773_v2 = vpack.c.bf16 %v763_v1, %v762_v0  ;;  %1589 = vmatpush3.bf16.msra.mxu0 %v1660_v4 }
 0x1ef   : > { %1570 = vmatprep.mubr.bf16.mxu0 %v773_v2 }
 0x1f0   : > { %1571 = vmatmul.mubr.bf16.gmra.mrb[36].mxu0 %v774_v3 }
 0x2a3   : > { %v1556_v5 = vpop.f32.mrb[20].mxu0 }
 0x2a4   : > { %v889_v6 = vadd.f32 %v1556_v5, %v1952_v61  ;;  %v880_v7 = vpop.f32.mrb[21].mxu0 }
 0x2a5   : > { %v881_v8 = vadd.f32 %v1952_v61, %v880_v7  ;;  %v1557_v9 = vpop.f32.mrb[22].mxu0 }
 0x2a6   : > { %v892_v10 = vadd.f32 %v1557_v9, %v1952_v61  ;;  %v883_v11 = vpop.f32.mrb[23].mxu0  ;;  %v960_v13 = vmax.f32 %v889_v6, 0.0 }
 0x2a7   : > { %v884_v12 = vadd.f32 %v1952_v61, %v883_v11  ;;  %v958_v15 = vmax.f32 %v881_v8, 0.0 }
 0x2a8   : > { %v961_v14 = vmax.f32 %v892_v10, 0.0  ;;  %v1976_v10 = vld [vmem:[%s2094_s8] ss:$0 sm:$0xff] }
 0x2a9   : > { %v959_v16 = vmax.f32 %v884_v12, 0.0 }
 0x2aa   : > { %v978_v17 = vpack.c.bf16 %v961_v14, %v960_v13 }
 0x2ab   : > { %v977_v18 = vpack.c.bf16 %v959_v16, %v958_v15  ;;  %v1560_v19 = vpop.f32.mrb[24].mxu0 }
 0x2ac   : > { %v905_v20 = vadd.f32 %v1560_v19, %v1952_v61  ;;  %v896_v21 = vpop.f32.mrb[25].mxu0 }
 0x2ad   : > { %v897_v22 = vadd.f32 %v1952_v61, %v896_v21  ;;  %v1561_v23 = vpop.f32.mrb[26].mxu0  ;;  %1590 = vmatprep.mubr.bf16.mxu0 %v977_v18 }
 0x2ae   : > { %v908_v24 = vadd.f32 %v1561_v23, %v1952_v61  ;;  %v899_v25 = vpop.f32.mrb[27].mxu0  ;;  %1591 = vmatmul.mubr.bf16.vlgmr.msra.gmra.mrb[40].mxu0 %v978_v17  ;;  %v964_v27 = vmax.f32 %v905_v20, 0.0  ;;  %v1246_v23 = vlaneseq }
 0x2af   : > { %v900_v26 = vadd.f32 %v1952_v61, %v899_v25  ;;  %v962_v29 = vmax.f32 %v897_v22, 0.0 }
 0x2b0   : > { %v965_v28 = vmax.f32 %v908_v24, 0.0 }
 0x2b1   : > { %v963_v30 = vmax.f32 %v900_v26, 0.0 }
 0x2b2   : > { %v980_v31 = vpack.c.bf16 %v965_v28, %v964_v27 }
 0x2b3   : > { %v979_v32 = vpack.c.bf16 %v963_v30, %v962_v29  ;;  %v1564_v33 = vpop.f32.mrb[28].mxu0 }
 0x2b4   : > { %v921_v34 = vadd.f32 %v1564_v33, %v1952_v61  ;;  %v912_v35 = vpop.f32.mrb[29].mxu0  ;;  %v1986_v33 = vand.u32 127, %v1246_v23 }
 0x2b5   : > { %v913_v36 = vadd.f32 %v1952_v61, %v912_v35  ;;  %v1565_v37 = vpop.f32.mrb[30].mxu0  ;;  %1594 = vmatprep.mubr.bf16.mxu1 %v979_v32 }
 0x2b6   : > { %v924_v38 = vadd.f32 %v1565_v37, %v1952_v61  ;;  %v915_v39 = vpop.f32.mrb[31].mxu0  ;;  %1595 = vmatmul.mubr.bf16.vlgmr.msra.gmra.mrb[20].mxu1 %v980_v31  ;;  %v968_v41 = vmax.f32 %v921_v34, 0.0  ;;  %vm1248_vm2 = vcmp.eq.s32.totalorder %v1986_v33, 0 }
 0x2b7   : > { %v916_v40 = vadd.f32 %v1952_v61, %v915_v39  ;;  %v966_v43 = vmax.f32 %v913_v36, 0.0 }
 0x2b8   : > { %v969_v42 = vmax.f32 %v924_v38, 0.0 }
 0x2b9   : > { %v967_v44 = vmax.f32 %v916_v40, 0.0 }
 0x2ba   : > { %v982_v45 = vpack.c.bf16 %v969_v42, %v968_v41 }
 0x2bb   : > { %v981_v46 = vpack.c.bf16 %v967_v44, %v966_v43  ;;  %v1568_v47 = vpop.f32.mrb[32].mxu0 }
 0x2bc   : > { %v937_v49 = vadd.f32 %v1568_v47, %v1952_v61  ;;  %v928_v50 = vpop.f32.mrb[33].mxu0 }
 0x2bd   : > { %v929_v51 = vadd.f32 %v1952_v61, %v928_v50  ;;  %v1569_v52 = vpop.f32.mrb[34].mxu0  ;;  %1598 = vmatprep.mubr.bf16.mxu1 %v981_v46 }
 0x2be   : > { %v940_v53 = vadd.f32 %v1569_v52, %v1952_v61  ;;  %v931_v54 = vpop.f32.mrb[35].mxu0  ;;  %1599 = vmatmul.mubr.bf16.gmra.mrb[24].mxu1 %v982_v45  ;;  %v972_v48 = vmax.f32 %v937_v49, 0.0 }
 0x2bf   : > { %v932_v55 = vadd.f32 %v1952_v61, %v931_v54  ;;  %v970_v57 = vmax.f32 %v929_v51, 0.0 }
 0x2c0   : > { %v973_v56 = vmax.f32 %v940_v53, 0.0 }
 0x2c1   : > { %v971_v58 = vmax.f32 %v932_v55, 0.0 }
 0x2c2   : > { %v984_v62 = vpack.c.bf16 %v973_v56, %v972_v48 }
 0x2c3   : > { %v983_v59 = vpack.c.bf16 %v971_v58, %v970_v57  ;;  %v1572_v63 = vpop.f32.mrb[36].mxu0 }
 0x2c4   : > { %v953_v0 = vadd.f32 %v1572_v63, %v1952_v61  ;;  %v944_v1 = vpop.f32.mrb[37].mxu0 }
 0x2c5   : > { %v945_v2 = vadd.f32 %v1952_v61, %v944_v1  ;;  %v1573_v3 = vpop.f32.mrb[38].mxu0  ;;  %1602 = vmatprep.mubr.bf16.mxu1 %v983_v59 }
 0x2c6   : > { %v947_v60 = vpop.f32.mrb[39].mxu0  ;;  %1603 = vmatmul.mubr.bf16.gmra.mrb[28].mxu1 %v984_v62  ;;  %v976_v5 = vmax.f32 %v953_v0, 0.0 }
 0x2c7   : > { %v948_v4 = vadd.f32 %v1952_v61, %v947_v60  ;;  %v974_v6 = vmax.f32 %v945_v2, 0.0 }
 0x2c8   : > { %v986_v9 = vpack.c.bf16 %v976_v5, %v976_v5 }
 0x2c9   : > { %v975_v7 = vmax.f32 %v948_v4, 0.0 }
 0x2cb   : > { %v985_v8 = vpack.c.bf16 %v975_v7, %v974_v6 }
 0x2cd   : > { %1606 = vmatprep.mubr.bf16.mxu1 %v985_v8 }
 0x2ce   : > { %1607 = vmatmul.mubr.bf16.gmra.mrb[32].mxu1 %v986_v9 }
 0x381   : > { %v1592_v11 = vpop.f32.mrb[40].mxu0 }
 0x382   : > { %v1101_v12 = vadd.f32 %v1592_v11, %v1976_v10  ;;  %v1092_v13 = vpop.f32.mrb[41].mxu0 }
 0x383   : > { %v1093_v14 = vadd.f32 %v1976_v10, %v1092_v13  ;;  %v1593_v15 = vpop.f32.mrb[42].mxu0 }
 0x384   : > { %v1172_v61 = vmul.f32 0.5, %v1101_v12  ;;  %v1104_v16 = vadd.f32 %v1593_v15, %v1976_v10  ;;  %v1095_v17 = vpop.f32.mrb[43].mxu0 }
 0x385   : > { %v1170_v18 = vmul.f32 0.5, %v1093_v14  ;;  %v1096_v19 = vadd.f32 %v1976_v10, %v1095_v17 }
 0x386   : > { %1661 = vtanh.f32 %v1172_v61  ;;  %v1173_v20 = vmul.f32 0.5, %v1104_v16 }
 0x387   : > { %1663 = vtanh.f32 %v1170_v18  ;;  %v1171_v21 = vmul.f32 0.5, %v1096_v19 }
 0x388   : > { %1665 = vtanh.f32 %v1173_v20 }
 0x389   : > { %1667 = vtanh.f32 %v1171_v21  ;;  %v1596_v22 = vpop.f32.mrb[20].mxu1 }
 0x38a   : > { %v1117_v24 = vadd.f32 %v1596_v22, %v1976_v10  ;;  %v1108_v25 = vpop.f32.mrb[21].mxu1 }
 0x38b   : > { %v1109_v26 = vadd.f32 %v1976_v10, %v1108_v25  ;;  %v1597_v27 = vpop.f32.mrb[22].mxu1 }
 0x38c   : > { %v1176_v28 = vmul.f32 0.5, %v1117_v24  ;;  %v1120_v29 = vadd.f32 %v1597_v27, %v1976_v10  ;;  %v1111_v30 = vpop.f32.mrb[23].mxu1 }
 0x38d   : > { %v1174_v31 = vmul.f32 0.5, %v1109_v26  ;;  %v1112_v32 = vadd.f32 %v1976_v10, %v1111_v30 }
 0x38e   : > { %1669 = vtanh.f32 %v1176_v28  ;;  %v1177_v34 = vmul.f32 0.5, %v1120_v29 }
 0x38f   : > { %1671 = vtanh.f32 %v1174_v31  ;;  %v1175_v35 = vmul.f32 0.5, %v1112_v32 }
 0x390   : > { %v1662_v36 = vpop.eup %1661  ;;  %1673 = vtanh.f32 %v1177_v34 }
 0x391   : > { %v1664_v37 = vpop.eup %1663  ;;  %v1210_v38 = vadd.f32 1.0, %v1662_v36  ;;  %1675 = vtanh.f32 %v1175_v35  ;;  %v1600_v39 = vpop.f32.mrb[24].mxu1 }
 0x392   : > { %v1666_v40 = vpop.eup %1665  ;;  %v1208_v41 = vadd.f32 1.0, %v1664_v37  ;;  %v1133_v42 = vadd.f32 %v1600_v39, %v1976_v10  ;;  %v1124_v43 = vpop.f32.mrb[25].mxu1 }
 0x393   : > { %v1668_v44 = vpop.eup %1667  ;;  %v1229_v45 = vmul.f32 0.5, %v1210_v38  ;;  %v1211_v46 = vadd.f32 1.0, %v1666_v40  ;;  %v1125_v47 = vadd.f32 %v1976_v10, %v1124_v43  ;;  %v1601_v49 = vpop.f32.mrb[26].mxu1 }
 0x394   : > { %v1227_v50 = vmul.f32 0.5, %v1208_v41  ;;  %v1209_v51 = vadd.f32 1.0, %v1668_v44  ;;  %v1180_v52 = vmul.f32 0.5, %v1133_v42  ;;  %v1136_v53 = vadd.f32 %v1601_v49, %v1976_v10  ;;  %v1127_v54 = vpop.f32.mrb[27].mxu1 }
 0x395   : > { %v1251_v55 = vsub.f32 1.0, %v1229_v45  ;;  %v1230_v48 = vmul.f32 0.5, %v1211_v46  ;;  %v1178_v56 = vmul.f32 0.5, %v1125_v47  ;;  %v1128_v57 = vadd.f32 %v1976_v10, %v1127_v54 }
 0x396   : > { %v1249_v58 = vsub.f32 1.0, %v1227_v50  ;;  %v1228_v62 = vmul.f32 0.5, %v1209_v51  ;;  %1677 = vtanh.f32 %v1180_v52  ;;  %v1181_v59 = vmul.f32 0.5, %v1136_v53 }
 0x397   : > { %v1270_v63 = vsel %vm1248_vm2, %v1251_v55, %v1229_v45  ;;  %v1252_v0 = vsub.f32 1.0, %v1230_v48  ;;  %1679 = vtanh.f32 %v1178_v56  ;;  %v1179_v1 = vmul.f32 0.5, %v1128_v57 }
 0x398   : > { %v1670_v2 = vpop.eup %1669  ;;  %1290 = vst.msk [vmem:[%s1997_s24 + $0x10] sm:$0xff] %vm1287_vm3, %v1270_v63  ;;  %v1268_v3 = vsel %vm1248_vm2, %v1249_v58, %v1227_v50  ;;  %v1250_v60 = vsub.f32 1.0, %v1228_v62  ;;  %1681 = vtanh.f32 %v1181_v59 }
 0x399   : > { %v1672_v4 = vpop.eup %1671  ;;  %1288 = vst.msk [vmem:[%s1997_s24] sm:$0xff] %vm1287_vm3, %v1268_v3  ;;  %v1271_v5 = vsel %vm1248_vm2, %v1252_v0, %v1230_v48  ;;  %v1214_v6 = vadd.f32 1.0, %v1670_v2  ;;  %1683 = vtanh.f32 %v1179_v1  ;;  %v1604_v7 = vpop.f32.mrb[28].mxu1 }
 0x39a   : > { %v1674_v8 = vpop.eup %1673  ;;  %1291 = vst.msk [vmem:[%s1997_s24 + $0x18] sm:$0xff] %vm1287_vm3, %v1271_v5  ;;  %v1269_v9 = vsel %vm1248_vm2, %v1250_v60, %v1228_v62  ;;  %v1212_v11 = vadd.f32 1.0, %v1672_v4  ;;  %v1149_v12 = vadd.f32 %v1604_v7, %v1976_v10  ;;  %v1140_v13 = vpop.f32.mrb[29].mxu1 }
 0x39b   : > { %v1676_v14 = vpop.eup %1675  ;;  %1289 = vst.msk [vmem:[%s1997_s24 + $0x8] sm:$0xff] %vm1287_vm3, %v1269_v9  ;;  %v1233_v15 = vmul.f32 0.5, %v1214_v6  ;;  %v1215_v61 = vadd.f32 1.0, %v1674_v8  ;;  %v1141_v16 = vadd.f32 %v1976_v10, %v1140_v13  ;;  %v1605_v17 = vpop.f32.mrb[30].mxu1 }
 0x39c   : > { %v1231_v18 = vmul.f32 0.5, %v1212_v11  ;;  %v1213_v19 = vadd.f32 1.0, %v1676_v14  ;;  %v1184_v20 = vmul.f32 0.5, %v1149_v12  ;;  %v1152_v21 = vadd.f32 %v1605_v17, %v1976_v10  ;;  %v1143_v22 = vpop.f32.mrb[31].mxu1 }
 0x39d   : > { %v1255_v23 = vsub.f32 1.0, %v1233_v15  ;;  %v1234_v24 = vmul.f32 0.5, %v1215_v61  ;;  %v1182_v25 = vmul.f32 0.5, %v1141_v16  ;;  %v1144_v26 = vadd.f32 %v1976_v10, %v1143_v22 }
 0x39e   : > { %v1253_v27 = vsub.f32 1.0, %v1231_v18  ;;  %v1232_v28 = vmul.f32 0.5, %v1213_v19  ;;  %1685 = vtanh.f32 %v1184_v20  ;;  %v1185_v29 = vmul.f32 0.5, %v1152_v21 }
 0x39f   : > { %v1274_v30 = vsel %vm1248_vm2, %v1255_v23, %v1233_v15  ;;  %v1256_v31 = vsub.f32 1.0, %v1234_v24  ;;  %1687 = vtanh.f32 %v1182_v25  ;;  %v1183_v32 = vmul.f32 0.5, %v1144_v26 }
 0x3a0   : > { %v1678_v34 = vpop.eup %1677  ;;  %1294 = vst.msk [vmem:[%s1997_s24 + $0x30] sm:$0xff] %vm1287_vm3, %v1274_v30  ;;  %v1272_v35 = vsel %vm1248_vm2, %v1253_v27, %v1231_v18  ;;  %v1254_v36 = vsub.f32 1.0, %v1232_v28  ;;  %1689 = vtanh.f32 %v1185_v29 }
 0x3a1   : > { %v1680_v37 = vpop.eup %1679  ;;  %1292 = vst.msk [vmem:[%s1997_s24 + $0x20] sm:$0xff] %vm1287_vm3, %v1272_v35  ;;  %v1275_v38 = vsel %vm1248_vm2, %v1256_v31, %v1234_v24  ;;  %v1218_v39 = vadd.f32 1.0, %v1678_v34  ;;  %1691 = vtanh.f32 %v1183_v32  ;;  %v1608_v40 = vpop.f32.mrb[32].mxu1 }
 0x3a2   : > { %v1682_v41 = vpop.eup %1681  ;;  %1295 = vst.msk [vmem:[%s1997_s24 + $0x38] sm:$0xff] %vm1287_vm3, %v1275_v38  ;;  %v1273_v42 = vsel %vm1248_vm2, %v1254_v36, %v1232_v28  ;;  %v1216_v43 = vadd.f32 1.0, %v1680_v37  ;;  %v1165_v44 = vadd.f32 %v1608_v40, %v1976_v10  ;;  %v1156_v45 = vpop.f32.mrb[33].mxu1 }
 0x3a3   : > { %v1684_v46 = vpop.eup %1683  ;;  %1293 = vst.msk [vmem:[%s1997_s24 + $0x28] sm:$0xff] %vm1287_vm3, %v1273_v42  ;;  %v1237_v47 = vmul.f32 0.5, %v1218_v39  ;;  %v1219_v49 = vadd.f32 1.0, %v1682_v41  ;;  %v1157_v50 = vadd.f32 %v1976_v10, %v1156_v45  ;;  %v1609_v51 = vpop.f32.mrb[34].mxu1 }
 0x3a4   : > { %v1235_v52 = vmul.f32 0.5, %v1216_v43  ;;  %v1217_v53 = vadd.f32 1.0, %v1684_v46  ;;  %v1188_v54 = vmul.f32 0.5, %v1165_v44  ;;  %v1159_v55 = vpop.f32.mrb[35].mxu1 }
 0x3a5   : > { %v1259_v48 = vsub.f32 1.0, %v1237_v47  ;;  %v1238_v56 = vmul.f32 0.5, %v1219_v49  ;;  %v1186_v57 = vmul.f32 0.5, %v1157_v50  ;;  %v1160_v58 = vadd.f32 %v1976_v10, %v1159_v55 }
 0x3a6   : > { %v1257_v62 = vsub.f32 1.0, %v1235_v52  ;;  %v1236_v59 = vmul.f32 0.5, %v1217_v53  ;;  %1693 = vtanh.f32 %v1188_v54 }
 0x3a7   : > { %v1278_v63 = vsel %vm1248_vm2, %v1259_v48, %v1237_v47  ;;  %v1260_v0 = vsub.f32 1.0, %v1238_v56  ;;  %1695 = vtanh.f32 %v1186_v57  ;;  %v1187_v1 = vmul.f32 0.5, %v1160_v58 }
 0x3a8   : > { %v1686_v2 = vpop.eup %1685  ;;  %1298 = vst.msk [vmem:[%s1997_s24 + $0x50] sm:$0xff] %vm1287_vm3, %v1278_v63  ;;  %v1276_v3 = vsel %vm1248_vm2, %v1257_v62, %v1235_v52  ;;  %v1258_v60 = vsub.f32 1.0, %v1236_v59 }
 0x3a9   : > { %v1688_v4 = vpop.eup %1687  ;;  %1296 = vst.msk [vmem:[%s1997_s24 + $0x40] sm:$0xff] %vm1287_vm3, %v1276_v3  ;;  %v1279_v10 = vsel %vm1248_vm2, %v1260_v0, %v1238_v56  ;;  %v1222_v5 = vadd.f32 1.0, %v1686_v2  ;;  %1697 = vtanh.f32 %v1187_v1 }
 0x3aa   : > { %v1690_v6 = vpop.eup %1689  ;;  %1299 = vst.msk [vmem:[%s1997_s24 + $0x58] sm:$0xff] %vm1287_vm3, %v1279_v10  ;;  %v1277_v7 = vsel %vm1248_vm2, %v1258_v60, %v1236_v59  ;;  %v1220_v8 = vadd.f32 1.0, %v1688_v4 }
 0x3ab   : > { %v1692_v9 = vpop.eup %1691  ;;  %1297 = vst.msk [vmem:[%s1997_s24 + $0x48] sm:$0xff] %vm1287_vm3, %v1277_v7  ;;  %v1241_v11 = vmul.f32 0.5, %v1222_v5  ;;  %v1223_v12 = vadd.f32 1.0, %v1690_v6 }
 0x3ac   : > { %v1239_v13 = vmul.f32 0.5, %v1220_v8  ;;  %v1221_v14 = vadd.f32 1.0, %v1692_v9 }
 0x3ad   : > { %v1263_v15 = vsub.f32 1.0, %v1241_v11  ;;  %v1242_v61 = vmul.f32 0.5, %v1223_v12 }
 0x3ae   : > { %v1261_v16 = vsub.f32 1.0, %v1239_v13  ;;  %v1240_v17 = vmul.f32 0.5, %v1221_v14 }
 0x3af   : > { %v1282_v18 = vsel %vm1248_vm2, %v1263_v15, %v1241_v11  ;;  %v1264_v19 = vsub.f32 1.0, %v1242_v61 }
 0x3b0   : > { %v1694_v20 = vpop.eup %1693  ;;  %1302 = vst.msk [vmem:[%s1997_s24 + $0x70] sm:$0xff] %vm1287_vm3, %v1282_v18  ;;  %v1280_v21 = vsel %vm1248_vm2, %v1261_v16, %v1239_v13  ;;  %v1262_v22 = vsub.f32 1.0, %v1240_v17 }
 0x3b1   : > { %v1696_v23 = vpop.eup %1695  ;;  %1300 = vst.msk [vmem:[%s1997_s24 + $0x60] sm:$0xff] %vm1287_vm3, %v1280_v21  ;;  %v1283_v24 = vsel %vm1248_vm2, %v1264_v19, %v1242_v61  ;;  %v1226_v25 = vadd.f32 1.0, %v1694_v20 }
 0x3b2   : > { %1303 = vst.msk [vmem:[%s1997_s24 + $0x78] sm:$0xff] %vm1287_vm3, %v1283_v24  ;;  %v1281_v26 = vsel %vm1248_vm2, %v1262_v22, %v1240_v17  ;;  %v1224_v27 = vadd.f32 1.0, %v1696_v23 }
 0x3b3   : > { %v1698_v28 = vpop.eup %1697  ;;  %1301 = vst.msk [vmem:[%s1997_s24 + $0x68] sm:$0xff] %vm1287_vm3, %v1281_v26  ;;  %v1245_v29 = vmul.f32 0.5, %v1226_v25 }
 0x3b4   : > { %v1243_v30 = vmul.f32 0.5, %v1224_v27  ;;  %v1225_v31 = vadd.f32 1.0, %v1698_v28 }
 0x3b5   : > { %v1267_v32 = vsub.f32 1.0, %v1245_v29 }
 0x3b6   : > { %v1265_v34 = vsub.f32 1.0, %v1243_v30  ;;  %v1244_v35 = vmul.f32 0.5, %v1225_v31 }
 0x3b7   : > { %v1286_v36 = vsel %vm1248_vm2, %v1267_v32, %v1245_v29 }
 0x3b8   : > { %1306 = vst.msk [vmem:[%s1997_s24 + $0x90] sm:$0xff] %vm1287_vm3, %v1286_v36  ;;  %v1284_v37 = vsel %vm1248_vm2, %v1265_v34, %v1243_v30  ;;  %v1266_v38 = vsub.f32 1.0, %v1244_v35 }
 0x3b9   : > { %1304 = vst.msk [vmem:[%s1997_s24 + $0x80] sm:$0xff] %vm1287_vm3, %v1284_v37 }
 0x3ba   : > { %v1285_v39 = vsel %vm1248_vm2, %v1266_v38, %v1244_v35 }
 0x3bb   : > { %1305 = vst.msk [vmem:[%s1997_s24 + $0x88] sm:$0xff] %vm1287_vm3, %v1285_v39 }
 0x3bc PF: > { %s19_s30 = sadd.s32 1, %s1705_s30  }
 0x3bd   : > { %p16_p4 = scmp.ge.s32.totalorder %s19_s30, 4  }
 0x3bf   :  { %18 = sbr.rel (!%p16_p4) target bundleno = 1 (0x1), region = 86 }

</bundles_post_ra>
